<compile_context>
chip_gen: v7x
topology: tpu7x:2x2x1
jax: 0.10.0
libtpu: 0.0.40
codegen_flags: <defaults>
</compile_context>

<pallas_src>
import jax
import jax.numpy as jnp
from jax.experimental import pallas as pl
from jax.experimental.pallas import tpu as pltpu

_SUBLANE = 8


def _round_up(x, m):
    return ((x + m - 1) // m) * m


def _mlp_kernel(x_ref, w1_ref, b1_ref, w2_ref, b2_ref, w3_ref, b3_ref, o_ref):
    # One batch tile per grid step; all weights resident in VMEM.
    x = x_ref[...]                                                      # (bm, 54) f32

    # fc1 + ReLU  (f32 matmul: raw features keep full precision, K=54 is tiny)
    h1 = jnp.dot(x, w1_ref[...], preferred_element_type=jnp.float32)   # (bm, 128)
    h1 = jnp.maximum(h1 + b1_ref[...], 0.0)
    # dropout (eval) == identity

    # fc2 + ReLU  (bf16 operands, f32 accumulation)
    h2 = jnp.dot(h1.astype(jnp.bfloat16), w2_ref[...],
                 preferred_element_type=jnp.float32)                   # (bm, 64)
    h2 = jnp.maximum(h2 + b2_ref[...], 0.0)
    # dropout (eval) == identity

    # fc3 (logits), written lane-masked as exactly 7 columns
    out = jnp.dot(h2.astype(jnp.bfloat16), w3_ref[...],
                  preferred_element_type=jnp.float32)                  # (bm, 7)
    o_ref[...] = (out + b3_ref[...]).astype(o_ref.dtype)


def covertype_forward(x, params, *, block_m=2048):
    """Runs the fused 3-layer MLP. x: (B, 54) float32. Returns (B, 7) float32."""
    w1, b1, w2, b2, w3, b3 = params
    B, D = x.shape
    assert D == w1.shape[0]
    h1_dim = w1.shape[1]          # 128
    h2_dim = w2.shape[1]          # 64
    num_classes = w3.shape[1]     # 7

    # Batch tile: a single full-extent block when the batch fits, otherwise
    # big sublane/lane-aligned tiles with a (possibly overhanging) last block.
    block_m = max(_round_up(block_m, _SUBLANE), _SUBLANE)
    if B <= block_m:
        bm = B                                   # full-extent block: always legal
        grid = (1,)
    else:
        bm = block_m                             # multiple of 8 (2048 default)
        grid = (pl.cdiv(B, bm),)                 # OOB rows masked by Pallas

    # Casts are tiny one-time ops on the (small) weights only; x stays f32.
    xf = x.astype(jnp.float32)
    w1f = w1.astype(jnp.float32)
    w2h = w2.astype(jnp.bfloat16)
    w3h = w3.astype(jnp.bfloat16)
    b1f = b1.astype(jnp.float32)
    b2f = b2.astype(jnp.float32)
    b3f = b3.astype(jnp.float32)

    def rep(i):
        # Weights/biases replicated across the batch grid.
        return (0, 0)

    flops = 2 * B * (D * h1_dim + h1_dim * h2_dim + h2_dim * num_classes)
    bytes_accessed = (B * D * 4 + B * num_classes * 4
                      + w1f.size * 4 + w2h.size * 2 + w3h.size * 2
                      + (b1f.size + b2f.size + b3f.size) * 4)

    out = pl.pallas_call(
        _mlp_kernel,
        out_shape=jax.ShapeDtypeStruct((B, num_classes), jnp.float32),
        grid_spec=pltpu.PrefetchScalarGridSpec(
            num_scalar_prefetch=0,
            grid=grid,
            in_specs=[
                pl.BlockSpec((bm, D), lambda i: (i, 0)),   # x tile (unpadded, f32)
                pl.BlockSpec(w1f.shape, rep),              # fc1.weight.T (54, 128) f32
                pl.BlockSpec(b1f.shape, rep),              # fc1.bias   (1, 128) f32
                pl.BlockSpec(w2h.shape, rep),              # fc2.weight.T (128, 64) bf16
                pl.BlockSpec(b2f.shape, rep),              # fc2.bias   (1, 64) f32
                pl.BlockSpec(w3h.shape, rep),              # fc3.weight.T (64, 7) bf16
                pl.BlockSpec(b3f.shape, rep),              # fc3.bias   (1, 7) f32
            ],
            out_specs=pl.BlockSpec((bm, num_classes), lambda i: (i, 0)),
        ),
        compiler_params=pltpu.CompilerParams(
            dimension_semantics=("parallel",),
            vmem_limit_bytes=32 * 1024 * 1024,
        ),
        cost_estimate=pl.CostEstimate(
            flops=flops, transcendentals=0, bytes_accessed=bytes_accessed),
    )(xf, w1f, b1f, w2h, b2f, w3h, b3f)

    return out


def init_params(key, input_dim=54, num_classes=7):
    """Deterministic synthetic parameters with the module's shapes."""
    ks = jax.random.split(key, 6)
    # Stored as (in, out) == PyTorch weight.T
    w1 = jax.random.normal(ks[0], (input_dim, 128), jnp.float32) * 0.1
    b1 = jax.random.normal(ks[1], (1, 128), jnp.float32) * 0.01
    w2 = jax.random.normal(ks[2], (128, 64), jnp.float32) * 0.1
    b2 = jax.random.normal(ks[3], (1, 64), jnp.float32) * 0.01
    w3 = jax.random.normal(ks[4], (64, num_classes), jnp.float32) * 0.1
    b3 = jax.random.normal(ks[5], (1, num_classes), jnp.float32) * 0.01
    return (w1, b1, w2, b2, w3, b3)


def reference_forward(x, params):
    """Pure-JAX f32 reference (eval-mode forward)."""
    w1, b1, w2, b2, w3, b3 = params
    h1 = jnp.maximum(x @ w1 + b1, 0.0)
    h2 = jnp.maximum(h1 @ w2 + b2, 0.0)
    return h2 @ w3 + b3


if __name__ == "__main__":
    key = jax.random.PRNGKey(0)
    k_x, k_p = jax.random.split(key)

    batch, input_dim, num_classes = 32, 54, 7
    x = jax.random.normal(k_x, (batch, input_dim), jnp.float32)
    params = init_params(k_p, input_dim, num_classes)

    out = covertype_forward(x, params)
    out = jax.block_until_ready(out)

    ref = reference_forward(x, params)
    assert out.shape == (batch, num_classes)
    # Layer 1 is f32; layers 2/3 use bf16 operands with f32 accumulation.
    assert jnp.allclose(out, ref, atol=3e-2, rtol=3e-2), "mismatch vs reference"

    print("KERNEL_OK")
</pallas_src>

<mosaic_0001>
module attributes {stable_mosaic.version = 11 : i64} {
  func.func @_mlp_kernel(%arg0: i32, %arg1: memref<32x54xf32, #tpu.memory_space<vmem>>, %arg2: memref<54x128xf32, #tpu.memory_space<vmem>>, %arg3: memref<1x128xf32, #tpu.memory_space<vmem>>, %arg4: memref<128x64xbf16, #tpu.memory_space<vmem>>, %arg5: memref<1x64xf32, #tpu.memory_space<vmem>>, %arg6: memref<64x7xbf16, #tpu.memory_space<vmem>>, %arg7: memref<1x7xf32, #tpu.memory_space<vmem>>, %arg8: memref<32x7xf32, #tpu.memory_space<vmem>>) attributes {dimension_semantics = [#tpu.dimension_semantics<parallel>], iteration_bounds = array<i64: 1>, scalar_prefetch = 0 : i64, scratch_operands = 0 : i64, tpu.core_type = #tpu.core_type<tc>, window_params = [{transform_indices = @transform_0, window_bounds = array<i64: 32, 54>}, {pipeline_mode = #tpu.pipeline_mode<synchronous>, transform_indices = @transform_1, window_bounds = array<i64: 54, 128>}, {pipeline_mode = #tpu.pipeline_mode<synchronous>, transform_indices = @transform_2, window_bounds = array<i64: 1, 128>}, {pipeline_mode = #tpu.pipeline_mode<synchronous>, transform_indices = @transform_3, window_bounds = array<i64: 128, 64>}, {pipeline_mode = #tpu.pipeline_mode<synchronous>, transform_indices = @transform_4, window_bounds = array<i64: 1, 64>}, {pipeline_mode = #tpu.pipeline_mode<synchronous>, transform_indices = @transform_5, window_bounds = array<i64: 64, 7>}, {pipeline_mode = #tpu.pipeline_mode<synchronous>, transform_indices = @transform_6, window_bounds = array<i64: 1, 7>}, {transform_indices = @transform_7, window_bounds = array<i64: 32, 7>}]} {
    %c0 = arith.constant 0 : index
    %c0_0 = arith.constant 0 : index
    %0 = vector.load %arg1[%c0, %c0_0] : memref<32x54xf32, #tpu.memory_space<vmem>>, vector<32x54xf32>
    %c0_1 = arith.constant 0 : index
    %c0_2 = arith.constant 0 : index
    %1 = vector.load %arg2[%c0_1, %c0_2] : memref<54x128xf32, #tpu.memory_space<vmem>>, vector<54x128xf32>
    %cst = arith.constant dense<0.000000e+00> : vector<32x128xf32>
    %2 = tpu.matmul %0, %1, %cst {dimension_numbers = #tpu.dot_dimension_numbers<[1], [0], [0], [1], [0, 0, 1, 1], [], []>} : vector<32x54xf32>, vector<54x128xf32>, vector<32x128xf32> -> vector<32x128xf32>
    %c0_3 = arith.constant 0 : index
    %c0_4 = arith.constant 0 : index
    %3 = vector.load %arg3[%c0_3, %c0_4] : memref<1x128xf32, #tpu.memory_space<vmem>>, vector<1x128xf32>
    %4 = vector.broadcast %3 : vector<1x128xf32> to vector<32x128xf32>
    %5 = arith.addf %2, %4 : vector<32x128xf32>
    %cst_5 = arith.constant 0.000000e+00 : f32
    %6 = vector.broadcast %cst_5 : f32 to vector<32x128xf32>
    %7 = arith.maximumf %5, %6 : vector<32x128xf32>
    %8 = arith.truncf %7 : vector<32x128xf32> to vector<32x128xbf16>
    %c0_6 = arith.constant 0 : index
    %c0_7 = arith.constant 0 : index
    %9 = vector.load %arg4[%c0_6, %c0_7] : memref<128x64xbf16, #tpu.memory_space<vmem>>, vector<128x64xbf16>
    %cst_8 = arith.constant dense<0.000000e+00> : vector<32x64xf32>
    %10 = tpu.matmul %8, %9, %cst_8 {dimension_numbers = #tpu.dot_dimension_numbers<[1], [0], [0], [1], [0, 0, 1, 1], [], []>} : vector<32x128xbf16>, vector<128x64xbf16>, vector<32x64xf32> -> vector<32x64xf32>
    %c0_9 = arith.constant 0 : index
    %c0_10 = arith.constant 0 : index
    %11 = vector.load %arg5[%c0_9, %c0_10] : memref<1x64xf32, #tpu.memory_space<vmem>>, vector<1x64xf32>
    %12 = vector.broadcast %11 : vector<1x64xf32> to vector<32x64xf32>
    %13 = arith.addf %10, %12 : vector<32x64xf32>
    %cst_11 = arith.constant 0.000000e+00 : f32
    %14 = vector.broadcast %cst_11 : f32 to vector<32x64xf32>
    %15 = arith.maximumf %13, %14 : vector<32x64xf32>
    %16 = arith.truncf %15 : vector<32x64xf32> to vector<32x64xbf16>
    %c0_12 = arith.constant 0 : index
    %c0_13 = arith.constant 0 : index
    %17 = vector.load %arg6[%c0_12, %c0_13] : memref<64x7xbf16, #tpu.memory_space<vmem>>, vector<64x7xbf16>
    %cst_14 = arith.constant dense<0.000000e+00> : vector<32x7xf32>
    %18 = tpu.matmul %16, %17, %cst_14 {dimension_numbers = #tpu.dot_dimension_numbers<[1], [0], [0], [1], [0, 0, 1, 1], [], []>} : vector<32x64xbf16>, vector<64x7xbf16>, vector<32x7xf32> -> vector<32x7xf32>
    %c0_15 = arith.constant 0 : index
    %c0_16 = arith.constant 0 : index
    %19 = vector.load %arg7[%c0_15, %c0_16] : memref<1x7xf32, #tpu.memory_space<vmem>>, vector<1x7xf32>
    %20 = vector.broadcast %19 : vector<1x7xf32> to vector<32x7xf32>
    %21 = arith.addf %18, %20 : vector<32x7xf32>
    %c0_17 = arith.constant 0 : index
    %c0_18 = arith.constant 0 : index
    %22 = vector.load %arg8[%c0_17, %c0_18] : memref<32x7xf32, #tpu.memory_space<vmem>>, vector<32x7xf32>
    tpu.vector_store %arg8[%c0_17, %c0_18], %21 {strides = array<i32>} : memref<32x7xf32, #tpu.memory_space<vmem>>, vector<32x7xf32>,
    return
  }
  func.func @transform_0(%arg0: i32) -> (i32, i32) {
    %c0_i32 = arith.constant 0 : i32
    %c0_i32_0 = arith.constant 0 : i32
    return %arg0, %c0_i32 : i32, i32
  }
  func.func @transform_1(%arg0: i32) -> (i32, i32) {
    %c0_i32 = arith.constant 0 : i32
    %c0_i32_0 = arith.constant 0 : i32
    %c0_i32_1 = arith.constant 0 : i32
    return %c0_i32, %c0_i32_0 : i32, i32
  }
  func.func @transform_2(%arg0: i32) -> (i32, i32) {
    %c0_i32 = arith.constant 0 : i32
    %c0_i32_0 = arith.constant 0 : i32
    %c0_i32_1 = arith.constant 0 : i32
    return %c0_i32, %c0_i32_0 : i32, i32
  }
  func.func @transform_3(%arg0: i32) -> (i32, i32) {
    %c0_i32 = arith.constant 0 : i32
    %c0_i32_0 = arith.constant 0 : i32
    %c0_i32_1 = arith.constant 0 : i32
    return %c0_i32, %c0_i32_0 : i32, i32
  }
  func.func @transform_4(%arg0: i32) -> (i32, i32) {
    %c0_i32 = arith.constant 0 : i32
    %c0_i32_0 = arith.constant 0 : i32
    %c0_i32_1 = arith.constant 0 : i32
    return %c0_i32, %c0_i32_0 : i32, i32
  }
  func.func @transform_5(%arg0: i32) -> (i32, i32) {
    %c0_i32 = arith.constant 0 : i32
    %c0_i32_0 = arith.constant 0 : i32
    %c0_i32_1 = arith.constant 0 : i32
    return %c0_i32, %c0_i32_0 : i32, i32
  }
  func.func @transform_6(%arg0: i32) -> (i32, i32) {
    %c0_i32 = arith.constant 0 : i32
    %c0_i32_0 = arith.constant 0 : i32
    %c0_i32_1 = arith.constant 0 : i32
    return %c0_i32, %c0_i32_0 : i32, i32
  }
  func.func @transform_7(%arg0: i32) -> (i32, i32) {
    %c0_i32 = arith.constant 0 : i32
    %c0_i32_0 = arith.constant 0 : i32
    return %arg0, %c0_i32 : i32, i32
  }
}

</mosaic_0001>

<bundles_post_ra>
// kernel: tpu_custom_call.1
= control target key start
LH: loop header
LB: loop body
LE: loop exit
PB: predicated region body
PF: predicated region fallthrough
CT: control target
= control target key end

     0   :  { %vm45_vm0 = vcmask 441344   ;;  %vm58_vm1 = vcmask 1045504   ;;  %vm318_vm2 = vcmask 523264   ;;  %vm374_vm3 = vcmask 56320   ;;  %s642_s1 = inlined_call_operand.vmem [shape: f32[54,128], index: 1, kind: input, shape index: {}]   ;;  %s643_s0 = inlined_call_operand.vmem [shape: f32[32,54], index: 0, kind: input, shape index: {}]   ;;  %s644_s3 = inlined_call_operand.vmem [shape: bf16[128,64], index: 3, kind: input, shape index: {}]   ;;  %s645_s5 = inlined_call_operand.vmem [shape: bf16[64,7], index: 5, kind: input, shape index: {}]   ;;  %s646_s2 = inlined_call_operand.vmem [shape: f32[1,128], index: 2, kind: input, shape index: {}]   ;;  %s647_s4 = inlined_call_operand.vmem [shape: f32[1,64], index: 4, kind: input, shape index: {}]   ;;  %s648_s6 = inlined_call_operand.vmem [shape: f32[1,7], index: 6, kind: input, shape index: {}]   ;;  %s649_s7 = inlined_call_operand.vmem [shape: f32[32,7], index: 7, kind: output, shape index: {}]  }
   0x1   :  { %v31_v0 = vld [vmem:[%s642_s1] sm:$0xff]  ;;  %v32_v1 = vld [vmem:[%s642_s1 + $0x8] sm:$0xff]  ;;  %v33_v2 = vld [vmem:[%s642_s1 + $0x10] sm:$0xff] }
   0x2   :  { %v484_v3 = vpack.c.bf16 %v32_v1, %v31_v0  ;;  %v34_v4 = vld [vmem:[%s642_s1 + $0x18] sm:$0xff]  ;;  %v35_v6 = vld [vmem:[%s642_s1 + $0x20] sm:$0xff]  ;;  %v36_v7 = vld [vmem:[%s642_s1 + $0x28] sm:$0xff] }
   0x3   :  { %v488_v5 = vpack.c.bf16 %v34_v4, %v33_v2  ;;  %v27_v8 = vld [vmem:[%s643_s0] sm:$0xff]  ;;  %v492_v10 = vpack.c.bf16 %v36_v7, %v35_v6  ;;  %v497_v11 = vld [vmem:[%s644_s3 + $0x8] sm:$0xff]   ;;  %v498_v12 = vld [vmem:[%s644_s3 + $0x10] sm:$0xff]  }
   0x4   :  { %485 = vmatprep.subr.bf16.mxu0 %v484_v3  ;;  %446 = vmatprep.mubr.msk.f32.mxu0 %vm45_vm0, %v27_v8  ;;  %v496_v9 = vld [vmem:[%s644_s3] sm:$0xff]   ;;  %v37_v13 = vld [vmem:[%s642_s1 + $0x30] sm:$0x3f]  ;;  %v499_v14 = vld [vmem:[%s644_s3 + $0x18] sm:$0xff]  }
   0x5   :  { %487 = vmatpush3.bf16.msra.mxu0 %v484_v3  ;;  %452 = vmatprep.subr.bf16.mxu1 %v496_v9  ;;  %v28_v15 = vld [vmem:[%s643_s0 + $0x8] sm:$0xff]  ;;  %v29_v16 = vld [vmem:[%s643_s0 + $0x10] sm:$0xff]  ;;  %v500_v17 = vld [vmem:[%s644_s3 + $0x20] sm:$0xff]  }
   0x6   :  { %489 = vmatprep.subr.bf16.mxu0 %v488_v5  ;;  %453 = vmatpush3.bf16.msra.mxu1 %v496_v9  ;;  %v30_v18 = vld [vmem:[%s643_s0 + $0x18] sm:$0xff]  ;;  %v501_v19 = vld [vmem:[%s644_s3 + $0x28] sm:$0xff]   ;;  %v502_v20 = vld [vmem:[%s644_s3 + $0x30] sm:$0xff]  }
   0x7   :  { %454 = vmatprep.subr.bf16.mxu1 %v497_v11  ;;  %v503_v21 = vld [vmem:[%s644_s3 + $0x38] sm:$0xff]   ;;  %v504_v22 = vld [vmem:[%s645_s5] sm:$0xff]   ;;  %v505_v23 = vld [vmem:[%s645_s5 + $0x8] sm:$0xff]  }
   0x8   :  { %v383_v24 = vld [vmem:[%s646_s2] ss:$0 sm:$0xff]  ;;  %v506_v39 = vld [vmem:[%s645_s5 + $0x10] sm:$0xff]   ;;  %v507_v40 = vld [vmem:[%s645_s5 + $0x18] sm:$0xff]  }
   0x9   :  { %491 = vmatpush3.bf16.msra.mxu0 %v488_v5  ;;  %v389_v41 = vld [vmem:[%s647_s4] ss:$0 sm:$0xff] }
   0xa   :  { %493 = vmatprep.subr.bf16.mxu0 %v492_v10  ;;  %455 = vmatpush3.bf16.msra.mxu1 %v497_v11  ;;  %v398_v56 = vld [vmem:[%s648_s6] ss:$0 sm:$0xff] }
   0xb   :  { %456 = vmatprep.subr.bf16.mxu1 %v498_v12 }
   0xd   :  { %495 = vmatpush3.bf16.msra.mxu0 %v492_v10 }
   0xe   :  { %444 = vmatprep.subr.msk.mxu0 %vm58_vm1, %v37_v13  ;;  %457 = vmatpush3.bf16.msra.mxu1 %v498_v12 }
   0xf   :  { %458 = vmatprep.subr.bf16.mxu1 %v499_v14 }
  0x11   :  { %445 = vmatpush3.msk.msra.mxu0 %vm58_vm1, %v37_v13 }
  0x12   :  { %447 = vmatmul.mubr.msk.f32.vlgmr.msra.gmra.mrb[0].mxu0 %vm45_vm0, %v28_v15  ;;  %459 = vmatpush3.bf16.msra.mxu1 %v499_v14 }
  0x13   :  { %449 = vmatprep.mubr.msk.f32.mxu0 %vm45_vm0, %v29_v16  ;;  %460 = vmatprep.subr.bf16.mxu1 %v500_v17 }
  0x14   :  { %472 = vmatprep.subr.bf16.mxu0 %v504_v22 }
  0x15   :  { %473 = vmatpush3.bf16.msra.mxu0 %v504_v22 }
  0x16   :  { %450 = vmatmul.mubr.msk.f32.gmra.mrb[2].mxu0 %vm45_vm0, %v30_v18  ;;  %461 = vmatpush3.bf16.msra.mxu1 %v500_v17 }
  0x17   :  { %462 = vmatprep.subr.bf16.mxu1 %v501_v19  ;;  %474 = vmatprep.subr.bf16.mxu0 %v505_v23 }
  0x19   :  { %475 = vmatpush3.bf16.msra.mxu0 %v505_v23 }
  0x1a   :  { %463 = vmatpush3.bf16.msra.mxu1 %v501_v19  ;;  %476 = vmatprep.subr.bf16.mxu0 %v506_v39 }
  0x1b   :  { %464 = vmatprep.subr.bf16.mxu1 %v502_v20 }
  0x1d   :  { %477 = vmatpush3.bf16.msra.mxu0 %v506_v39 }
  0x1e   :  { %465 = vmatpush3.bf16.msra.mxu1 %v502_v20  ;;  %478 = vmatprep.subr.bf16.mxu0 %v507_v40 }
  0x1f   :  { %466 = vmatprep.subr.bf16.mxu1 %v503_v21 }
  0x21   :  { %479 = vmatpush3.bf16.msra.mxu0 %v507_v40 }
  0x22   :  { %467 = vmatpush3.bf16.msra.mxu1 %v503_v21 }
  0xe5   :  { %v448_v25 = vpop.f32.mrb[0].mxu0 }
  0xe6   :  { %v134_v26 = vadd.f32 %v448_v25, %v383_v24  ;;  %v128_v27 = vpop.f32.mrb[1].mxu0 }
  0xe7   :  { %v129_v28 = vadd.f32 %v383_v24, %v128_v27 }
  0xe8   :  { %v148_v29 = vmax.f32 %v134_v26, 0.0 }
  0xe9   :  { %v147_v30 = vmax.f32 %v129_v28, 0.0  ;;  %v451_v31 = vpop.f32.mrb[2].mxu0 }
  0xea   :  { %v144_v32 = vadd.f32 %v451_v31, %v383_v24  ;;  %v138_v33 = vpop.f32.mrb[3].mxu0 }
  0xeb   :  { %v139_v34 = vadd.f32 %v383_v24, %v138_v33  ;;  %v151_v35 = vpack.c.bf16 %v148_v29, %v147_v30 }
  0xec   :  { %v150_v36 = vmax.f32 %v144_v32, 0.0 }
  0xed   :  { %v149_v37 = vmax.f32 %v139_v34, 0.0  ;;  %468 = vmatprep.mubr.bf16.mxu1 %v151_v35 }
  0xef   :  { %v152_v38 = vpack.c.bf16 %v150_v36, %v149_v37 }
  0xf1   :  { %469 = vmatmul.mubr.bf16.vlgmr.msra.gmra.mrb[0].mxu1 %v152_v38 }
 0x1c4   :  { %v470_v42 = vpop.f32.mrb[0].mxu1 }
 0x1c5   :  { %v267_v43 = vadd.f32 %v470_v42, %v389_v41  ;;  %v258_v44 = vpop.f32.mrb[1].mxu1 }
 0x1c6   :  { %v259_v45 = vadd.f32 %v389_v41, %v258_v44  ;;  %v471_v46 = vpop.f32.mrb[2].mxu1 }
 0x1c7   :  { %v270_v47 = vadd.f32 %v471_v46, %v389_v41  ;;  %v261_v48 = vpop.f32.mrb[3].mxu1  ;;  %v275_v50 = vmax.f32 %v267_v43, 0.0 }
 0x1c8   :  { %v262_v49 = vadd.f32 %v389_v41, %v261_v48  ;;  %v273_v52 = vmax.f32 %v259_v45, 0.0 }
 0x1c9   :  { %v276_v51 = vmax.f32 %v270_v47, 0.0 }
 0x1ca   :  { %v274_v53 = vmax.f32 %v262_v49, 0.0 }
 0x1cb   :  { %v278_v54 = vpack.c.bf16 %v276_v51, %v275_v50 }
 0x1cc   :  { %v277_v55 = vpack.c.bf16 %v274_v53, %v273_v52 }
 0x1ce   :  { %480 = vmatprep.mubr.msk.bf16.mxu0 %vm318_vm2, %v277_v55 }
 0x1cf   :  { %481 = vmatmul.mubr.msk.bf16.vlgmr.msra.gmra.mrb[4].mxu0 %vm318_vm2, %v278_v54 }
 0x2a2   :  { %v482_v57 = vpop.f32.mrb[4].mxu0 }
 0x2a3   :  { %v368_v58 = vadd.f32 %v482_v57, %v398_v56  ;;  %v359_v59 = vpop.f32.mrb[5].mxu0 }
 0x2a4   :  { %v360_v60 = vadd.f32 %v398_v56, %v359_v59  ;;  %v483_v61 = vpop.f32.mrb[6].mxu0 }
 0x2a5   :  { %377 = vst.msk [vmem:[%s649_s7 + $0x10] sm:$0xff] %vm374_vm3, %v368_v58  ;;  %v371_v62 = vadd.f32 %v483_v61, %v398_v56  ;;  %v362_v63 = vpop.f32.mrb[7].mxu0 }
 0x2a6   :  { %375 = vst.msk [vmem:[%s649_s7] sm:$0xff] %vm374_vm3, %v360_v60  ;;  %v363_v0 = vadd.f32 %v398_v56, %v362_v63 }
 0x2a7   :  { %378 = vst.msk [vmem:[%s649_s7 + $0x18] sm:$0xff] %vm374_vm3, %v371_v62 }
 0x2a8   :  { %376 = vst.msk [vmem:[%s649_s7 + $0x8] sm:$0xff] %vm374_vm3, %v363_v0 }

</bundles_post_ra>
